<compile_context>
chip_gen: v7x
topology: tpu7x:2x2x1
jax: 0.10.0
libtpu: 0.0.40
codegen_flags: <defaults>
</compile_context>

<pallas_src>
import numpy as np
import jax
import jax.numpy as jnp
from jax.experimental import pallas as pl
from jax.experimental.pallas import tpu as pltpu


def _round_up(x, m):
    return (x + m - 1) // m * m


def _cdiv(a, b):
    return -(-a // b)


def _pick_block(dim, target, gran):
    """Block size (multiple of `gran`, <=~target) that exactly divides a minimally padded dim."""
    dim = _round_up(max(dim, 1), gran)
    nblocks = max(1, _cdiv(dim, target))
    block = _round_up(_cdiv(dim, nblocks), gran)
    return block, block * nblocks


# ---------------------------------------------------------------------------
# Fused kernel:  out = leaky_relu( (X @ W^T) * scale + shift )
# The output block's index_map is constant along k, so o_ref stays VMEM-resident
# across the reduction and is used directly as the f32 accumulator.
# ---------------------------------------------------------------------------
def _d1d_kernel(x_ref, wt_ref, scale_ref, shift_ref, o_ref):
    k = pl.program_id(2)
    nk = pl.num_programs(2)

    part = jnp.dot(x_ref[...], wt_ref[...], preferred_element_type=jnp.float32)

    @pl.when(k == 0)
    def _():
        o_ref[...] = part

    @pl.when(k > 0)
    def _():
        o_ref[...] += part

    @pl.when(k == nk - 1)
    def _():
        y = o_ref[...] * scale_ref[...] + shift_ref[...]        # BatchNorm affine
        o_ref[...] = jnp.maximum(y, 0.2 * y)                    # LeakyReLU(0.2)


# ---------------------------------------------------------------------------
# Factory: folds BN, transposes/pads/casts the weight ONCE, returns a forward fn.
# ---------------------------------------------------------------------------
def make_d1d(weight, gamma, beta, running_mean, running_var, eps=1e-5,
             bm_target=512, bn_target=1024, bk_target=1024,
             compute_dtype=jnp.bfloat16):
    """weight: (N, K) in PyTorch nn.Linear layout (no bias). Returns forward(x)->(B,N) f32."""
    weight = jnp.asarray(weight, jnp.float32)
    N, K = weight.shape

    # Fold eval-mode BatchNorm into per-output-channel scale/shift.
    scale = jnp.asarray(gamma, jnp.float32) / jnp.sqrt(
        jnp.asarray(running_var, jnp.float32) + eps)
    shift = jnp.asarray(beta, jnp.float32) - jnp.asarray(running_mean, jnp.float32) * scale

    # Divisor-aware tiling of K / N (multiples of 128 -> lane-dense, unmasked stores).
    bk, Kp = _pick_block(K, bk_target, 128)
    bn, Np = _pick_block(N, bn_target, 128)

    # One-time weight prep (hoisted out of the per-call forward path).
    wt_p = jnp.zeros((Kp, Np), compute_dtype).at[:K, :N].set(
        weight.T.astype(compute_dtype))
    scale_p = jnp.zeros((1, Np), jnp.float32).at[0, :N].set(scale)
    shift_p = jnp.zeros((1, Np), jnp.float32).at[0, :N].set(shift)

    in_bytes = jnp.dtype(compute_dtype).itemsize

    def forward(x):
        B, K_in = x.shape
        assert K_in == K, f"expected {K} input features, got {K_in}"

        bm, Bp = _pick_block(B, bm_target, 8)
        # v7x has 2 TensorCores: make sure the 'parallel' axes have >=2 blocks
        # whenever the (padded) batch allows a split, so the second core isn't idle.
        if (Bp // bm) * (Np // bn) < 2 and Bp >= 16:
            bm = _round_up(_cdiv(Bp, 2), 8)
            Bp = 2 * bm

        # Pad x.  The K pad MUST be explicit zeros (it feeds the reduction);
        # padded B rows only land in output that is sliced away below.
        if (Bp, Kp) == (B, K):
            xp = x.astype(compute_dtype)
        else:
            xp = jnp.zeros((Bp, Kp), compute_dtype).at[:B, :K].set(
                x.astype(compute_dtype))

        grid = (Bp // bm, Np // bn, Kp // bk)

        # Double-buffered VMEM footprint + headroom; clamp well under v7x's 64 MiB.
        vmem_bytes = (2 * bm * bk * in_bytes + 2 * bk * bn * in_bytes
                      + 2 * bm * bn * 4 + 4 * bn * 4)
        vmem_limit = int(min(max(vmem_bytes + (8 << 20), 24 << 20), 48 << 20))

        out = pl.pallas_call(
            _d1d_kernel,
            out_shape=jax.ShapeDtypeStruct((Bp, Np), jnp.float32),
            grid_spec=pltpu.PrefetchScalarGridSpec(
                num_scalar_prefetch=0,
                grid=grid,
                in_specs=[
                    pl.BlockSpec((bm, bk), lambda i, j, k: (i, k)),   # X tile (bf16)
                    pl.BlockSpec((bk, bn), lambda i, j, k: (k, j)),   # W^T tile (bf16)
                    pl.BlockSpec((1, bn), lambda i, j, k: (0, j)),    # BN scale (f32)
                    pl.BlockSpec((1, bn), lambda i, j, k: (0, j)),    # BN shift (f32)
                ],
                out_specs=pl.BlockSpec((bm, bn), lambda i, j, k: (i, j)),
            ),
            compiler_params=pltpu.CompilerParams(
                dimension_semantics=("parallel", "parallel", "arbitrary"),
                vmem_limit_bytes=vmem_limit),
        )(xp, wt_p, scale_p, shift_p)

        if (Bp, Np) != (B, N):
            out = out[:B, :N]
        return out

    return forward


# ---------------------------------------------------------------------------
# Pure NumPy reference mirroring the PyTorch module (eval-mode BN).
# ---------------------------------------------------------------------------
def d1d_ref(x, weight, gamma, beta, running_mean, running_var, eps=1e-5):
    y = x @ weight.T
    y = (y - running_mean) / np.sqrt(running_var + eps) * gamma + beta
    return np.where(y >= 0.0, y, 0.2 * y)


if __name__ == "__main__":
    key = jax.random.PRNGKey(0)
    B, Cin, Cout = 16, 32, 64
    k1, k2, k3, k4, k5, k6 = jax.random.split(key, 6)

    x = jax.random.normal(k1, (B, Cin), dtype=jnp.float32)
    weight = jax.random.normal(k2, (Cout, Cin), dtype=jnp.float32) * 0.1
    gamma = 1.0 + 0.1 * jax.random.normal(k3, (Cout,), dtype=jnp.float32)
    beta = 0.1 * jax.random.normal(k4, (Cout,), dtype=jnp.float32)
    running_mean = 0.1 * jax.random.normal(k5, (Cout,), dtype=jnp.float32)
    running_var = jax.nn.softplus(
        jax.random.normal(k6, (Cout,), dtype=jnp.float32)) + 0.5

    fwd = jax.jit(make_d1d(weight, gamma, beta, running_mean, running_var))
    out = jax.block_until_ready(fwd(x))

    ref = d1d_ref(np.asarray(x), np.asarray(weight), np.asarray(gamma),
                  np.asarray(beta), np.asarray(running_mean),
                  np.asarray(running_var))
    assert out.shape == (B, Cout)
    # bf16 MXU inputs (f32 accumulation) -> loosened tolerance vs the f32 reference.
    assert np.allclose(np.asarray(out), ref, atol=5e-2, rtol=5e-2), "d1d mismatch"

    print("KERNEL_OK")
</pallas_src>

<mosaic_0001>
module attributes {stable_mosaic.version = 11 : i64} {
  func.func @_d1d_kernel(%arg0: i32, %arg1: i32, %arg2: i32, %arg3: memref<8x128xbf16, #tpu.memory_space<vmem>>, %arg4: memref<128x128xbf16, #tpu.memory_space<vmem>>, %arg5: memref<1x128xf32, #tpu.memory_space<vmem>>, %arg6: memref<1x128xf32, #tpu.memory_space<vmem>>, %arg7: memref<8x128xf32, #tpu.memory_space<vmem>>) attributes {dimension_semantics = [#tpu.dimension_semantics<parallel>, #tpu.dimension_semantics<parallel>, #tpu.dimension_semantics<arbitrary>], iteration_bounds = array<i64: 2, 1, 1>, scalar_prefetch = 0 : i64, scratch_operands = 0 : i64, tpu.core_type = #tpu.core_type<tc>, window_params = [{transform_indices = @transform_0, window_bounds = array<i64: 8, 128>}, {transform_indices = @transform_1, window_bounds = array<i64: 128, 128>}, {transform_indices = @transform_2, window_bounds = array<i64: 1, 128>}, {transform_indices = @transform_3, window_bounds = array<i64: 1, 128>}, {transform_indices = @transform_4, window_bounds = array<i64: 8, 128>}]} {
    %c0 = arith.constant 0 : index
    %c0_0 = arith.constant 0 : index
    %0 = vector.load %arg3[%c0, %c0_0] : memref<8x128xbf16, #tpu.memory_space<vmem>>, vector<8x128xbf16>
    %c0_1 = arith.constant 0 : index
    %c0_2 = arith.constant 0 : index
    %1 = vector.load %arg4[%c0_1, %c0_2] : memref<128x128xbf16, #tpu.memory_space<vmem>>, vector<128x128xbf16>
    %cst = arith.constant dense<0.000000e+00> : vector<8x128xf32>
    %2 = tpu.matmul %0, %1, %cst {dimension_numbers = #tpu.dot_dimension_numbers<[1], [0], [0], [1], [0, 0, 1, 1], [], []>} : vector<8x128xbf16>, vector<128x128xbf16>, vector<8x128xf32> -> vector<8x128xf32>
    %c0_i32 = arith.constant 0 : i32
    %3 = arith.cmpi eq, %arg2, %c0_i32 : i32
    %4 = arith.extui %3 : i1 to i32
    %c0_i32_3 = arith.constant 0 : i32
    %5 = arith.cmpi ne, %4, %c0_i32_3 : i32
    scf.if %5 {
      %c0_8 = arith.constant 0 : index
      %c0_9 = arith.constant 0 : index
      %12 = vector.load %arg7[%c0_8, %c0_9] : memref<8x128xf32, #tpu.memory_space<vmem>>, vector<8x128xf32>
      tpu.vector_store %arg7[%c0_8, %c0_9], %2 {strides = array<i32>} : memref<8x128xf32, #tpu.memory_space<vmem>>, vector<8x128xf32>,
    } else {
    }
    %c0_i32_4 = arith.constant 0 : i32
    %6 = arith.cmpi sgt, %arg2, %c0_i32_4 : i32
    %7 = arith.extui %6 : i1 to i32
    %c0_i32_5 = arith.constant 0 : i32
    %8 = arith.cmpi ne, %7, %c0_i32_5 : i32
    scf.if %8 {
      %c0_8 = arith.constant 0 : index
      %c0_9 = arith.constant 0 : index
      %12 = vector.load %arg7[%c0_8, %c0_9] : memref<8x128xf32, #tpu.memory_space<vmem>>, vector<8x128xf32>
      %13 = arith.addf %12, %2 : vector<8x128xf32>
      %c0_10 = arith.constant 0 : index
      %c0_11 = arith.constant 0 : index
      %14 = vector.load %arg7[%c0_10, %c0_11] : memref<8x128xf32, #tpu.memory_space<vmem>>, vector<8x128xf32>
      tpu.vector_store %arg7[%c0_10, %c0_11], %13 {strides = array<i32>} : memref<8x128xf32, #tpu.memory_space<vmem>>, vector<8x128xf32>,
    } else {
    }
    %c0_i32_6 = arith.constant 0 : i32
    %9 = arith.cmpi eq, %arg2, %c0_i32_6 : i32
    %10 = arith.extui %9 : i1 to i32
    %c0_i32_7 = arith.constant 0 : i32
    %11 = arith.cmpi ne, %10, %c0_i32_7 : i32
    scf.if %11 {
      %c0_8 = arith.constant 0 : index
      %c0_9 = arith.constant 0 : index
      %12 = vector.load %arg7[%c0_8, %c0_9] : memref<8x128xf32, #tpu.memory_space<vmem>>, vector<8x128xf32>
      %c0_10 = arith.constant 0 : index
      %c0_11 = arith.constant 0 : index
      %13 = vector.load %arg5[%c0_10, %c0_11] : memref<1x128xf32, #tpu.memory_space<vmem>>, vector<1x128xf32>
      %14 = vector.broadcast %13 : vector<1x128xf32> to vector<8x128xf32>
      %15 = arith.mulf %12, %14 : vector<8x128xf32>
      %c0_12 = arith.constant 0 : index
      %c0_13 = arith.constant 0 : index
      %16 = vector.load %arg6[%c0_12, %c0_13] : memref<1x128xf32, #tpu.memory_space<vmem>>, vector<1x128xf32>
      %17 = vector.broadcast %16 : vector<1x128xf32> to vector<8x128xf32>
      %18 = arith.addf %15, %17 : vector<8x128xf32>
      %cst_14 = arith.constant 2.000000e-01 : f32
      %19 = vector.broadcast %cst_14 : f32 to vector<8x128xf32>
      %20 = arith.mulf %19, %18 : vector<8x128xf32>
      %21 = arith.maximumf %18, %20 : vector<8x128xf32>
      %c0_15 = arith.constant 0 : index
      %c0_16 = arith.constant 0 : index
      %22 = vector.load %arg7[%c0_15, %c0_16] : memref<8x128xf32, #tpu.memory_space<vmem>>, vector<8x128xf32>
      tpu.vector_store %arg7[%c0_15, %c0_16], %21 {strides = array<i32>} : memref<8x128xf32, #tpu.memory_space<vmem>>, vector<8x128xf32>,
    } else {
    }
    return
  }
  func.func @transform_0(%arg0: i32, %arg1: i32, %arg2: i32) -> (i32, i32) {
    %c0_i32 = arith.constant 0 : i32
    return %arg0, %arg2 : i32, i32
  }
  func.func @transform_1(%arg0: i32, %arg1: i32, %arg2: i32) -> (i32, i32) {
    %c0_i32 = arith.constant 0 : i32
    return %arg2, %arg1 : i32, i32
  }
  func.func @transform_2(%arg0: i32, %arg1: i32, %arg2: i32) -> (i32, i32) {
    %c0_i32 = arith.constant 0 : i32
    %c0_i32_0 = arith.constant 0 : i32
    return %c0_i32, %arg1 : i32, i32
  }
  func.func @transform_3(%arg0: i32, %arg1: i32, %arg2: i32) -> (i32, i32) {
    %c0_i32 = arith.constant 0 : i32
    %c0_i32_0 = arith.constant 0 : i32
    return %c0_i32, %arg1 : i32, i32
  }
  func.func @transform_4(%arg0: i32, %arg1: i32, %arg2: i32) -> (i32, i32) {
    %c0_i32 = arith.constant 0 : i32
    return %arg0, %arg1 : i32, i32
  }
}

</mosaic_0001>

<bundles_post_ra>
// kernel: forward.1
= control target key start
LH: loop header
LB: loop body
LE: loop exit
PB: predicated region body
PF: predicated region fallthrough
CT: control target
= control target key end

     0   :  { %9 = vsyncpa [#allocation3], 0  ;;  %s1099_s0 = inlined_call_operand.vmem [shape: bf16[16,128], index: 0, kind: input, shape index: {}]   ;;  %s1100_s1 = inlined_call_operand.vmem [shape: bf16[128,128], index: 1, kind: input, shape index: {}]   ;;  %s1101_s2 = inlined_call_operand.hbm [shape: f32[1,128], index: 2, kind: input, shape index: {}]   ;;  %s1102_s3 = inlined_call_operand.hbm [shape: f32[1,128], index: 3, kind: input, shape index: {}]   ;;  %s1103_s4 = inlined_call_operand.hbm [shape: f32[16,128], index: 4, kind: output, shape index: {}]  }
   0x1   :  { %10 = vsyncpa [#allocation6], 0 }
   0x2   :  { %11 = vsyncpa [#allocation4], 0 }
   0x3   :  { %13 = vsyncpa [#allocation4 + $0x1], 0  ;;  %s887_s15 = smov 0   ;;  %s889_s16 = smov 0  }
   0x4   :  { %s891_s17 = smov 0   ;;  %s893_s18 = smov 0  }
   0x5   :  { %s895_s19 = smov 0   ;;  %s897_s20 = smov 0  }
   0x6 LB: > { %s572_s21 = sadd.s32 4294967295, %s855_s20   ;;  %s573_s22 = sadd.s32 4294967294, %s855_s20   ;;  %s855_s20 = sphi %s897_s20, %s19_s20   ;;  %s851_s19 = sphi %s895_s19, %s1121_s19   ;;  %s847_s18 = sphi %s893_s18, %s1120_s18   ;;  %s843_s17 = sphi %s891_s17, %s1119_s17   ;;  %s839_s16 = sphi %s889_s16, %s1118_s16   ;;  %s835_s15 = sphi %s887_s15, %s1117_s15  }
   0x7   : > { %s38_s23 = sadd.s32 1, %s851_s19  ;;  %s155_s24 = sadd.s32 1, %s843_s17 }
   0x8   : > { %p40_p0 = scmp.ge.s32.totalorder %s38_s23, 2  ;;  %p165_p1 = scmp.ne.s32.totalorder %s843_s17, %s839_s16 }
   0x9   : > { %p166_p2 = scmp.eq.s32.totalorder %s572_s21, 1  ;;  %p171_p3 = scmp.ne.s32.totalorder %s839_s16, %s835_s15 }
   0xa   : > { %s1123_s23 = smov (%p40_p0, %s38_s23), 0  ;;  %p172_p5 = scmp.eq.s32.totalorder %s573_s22, 1 }
   0xb   : > { %p927_p4 = por %p166_p2, %p165_p1  ;;  %s150_s26 = ssub.s32 %s851_s19, %s1123_s23 }
   0xc   : > { %p574_p6 = scmp.ge.s32.totalorder %s855_s20, 1  ;;  %p153_p7 = scmp.eq.s32.totalorder %s150_s26, 0 }
   0xd   : > { %s1108_s25 = scalar_select %p927_p4, 1, 0 }
   0xe   : > { %p934_p8 = por %p172_p5, %p171_p3  ;;  %p179_p9 = scmp.lt.s32.totalorder %s855_s20, 3 }
   0xf   : > { %s940_s28 = scalar_select %p153_p7, %s843_s17, %s155_s24  }
  0x10   : > { %s1109_s27 = scalar_select %p934_p8, 1, 0 }
  0x11   : > { %p942_p10 = pnand %p574_p6, %p179_p9  ;;  %p946_p11 = scmp.eq.s32.totalorder %s572_s21, 0 }
  0x12   : > { %s857_s5 = smov [#allocation2]   ;;  %s858_s7 = smov [#allocation5]  }
  0x13   : > { %s1110_s29 = scalar_select %p942_p10, 1, 0 }
  0x14   : > { %s1111_s30 = scalar_select %p946_p11, 1, 0 }
  0x15   : > { %p637_p12 = pneg %p942_p10  ;;  %s206_s6 = sshll.u32 %s857_s5, 4  ;;  %s207_s6 = int_to_ptr.vmem [resolvable:$true] %s206_s6 }
  0x16   : > { %s219_s8 = sshll.u32 %s858_s7, 4  ;;  %s713_s12 = scalar_lea.hbm %s1101_s2, 16  ;;  %s958_s8 = int_to_ptr.vmem [resolvable:$true] %s219_s8 }
  0x17   : > { %p954_p13 = pnand %p946_p11, %p637_p12  ;;  %p714_p0 = scmp.ne.s32.totalorder %s1101_s2, %s713_s12 }
  0x18   : > { %p720_p5 = scmp.lt.u32.totalorder %s713_s12, %s1101_s2 }
  0x19   : > { %p715_p1 = pneg %p954_p13 }
  0x1b   : > { %p716_p2 = pnand %p715_p1, %p714_p0 }
  0x1d   : > { %p717_p3 = pneg %p716_p2 }
  0x1f   : > { %p722_p6 = pnand %p720_p5, %p717_p3 }
  0x21   : > { %725 = shalt.err (!%p722_p6)
}
  0x22   : > { %s726_s24 = scalar_lea.vmem %s207_s6, 16  ;;  %s733_s26 = scalar_lea.vmem %s207_s6, 32 }
  0x23   : > { %p727_p7 = scmp.ne.s32.totalorder %s207_s6, %s726_s24  ;;  %p734_p8 = scmp.lt.s32.totalorder %s207_s6, %s207_s6 }
  0x24   : > { %p735_p4 = scmp.lt.s32.totalorder %s733_s26, %s726_s24 }
  0x25   : > { %p729_p9 = pnand %p727_p7, %p715_p1 }
  0x26   : > { %p736_p11 = por %p735_p4, %p734_p8 }
  0x27   : > { %p730_p12 = pneg %p729_p9 }
  0x29   : > { %p737_p10 = pnand %p736_p11, %p730_p12 }
  0x2b   : > { %740 = shalt.err (!%p737_p10)
}
  0x2c   : > { %640 = dma.hbm_to_vmem [thread:$0]  (!%p954_p13), %s1101_s2, 16, %s207_s6, [#allocation3]  }
  0x2d   : > { %s741_s12 = scalar_lea.hbm %s1102_s3, 16 }
  0x2e   : > { %p742_p0 = scmp.ne.s32.totalorder %s1102_s3, %s741_s12  ;;  %p748_p10 = scmp.lt.u32.totalorder %s741_s12, %s1102_s3 }
  0x30   : > { %p744_p4 = pnand %p742_p0, %p715_p1 }
  0x32   : > { %p745_p8 = pneg %p744_p4 }
  0x34   : > { %p750_p11 = pnand %p748_p10, %p745_p8 }
  0x36   : > { %753 = shalt.err (!%p750_p11)
}
  0x37   : > { %s754_s6 = scalar_lea.vmem %s958_s8, 16  ;;  %s761_s24 = scalar_lea.vmem %s958_s8, 32 }
  0x38   : > { %p755_p2 = scmp.ne.s32.totalorder %s958_s8, %s754_s6  ;;  %p762_p6 = scmp.lt.s32.totalorder %s958_s8, %s958_s8 }
  0x39   : > { %p763_p7 = scmp.lt.s32.totalorder %s761_s24, %s754_s6 }
  0x3a   : > { %p757_p3 = pnand %p755_p2, %p715_p1 }
  0x3b   : > { %p764_p9 = por %p763_p7, %p762_p6 }
  0x3c   : > { %p758_p5 = pneg %p757_p3 }
  0x3e   : > { %p765_p12 = pnand %p764_p9, %p758_p5 }
  0x40   : > { %768 = shalt.err (!%p765_p12)
}
  0x41   : > { %643 = dma.hbm_to_vmem [thread:$0]  (!%p954_p13), %s1102_s3, 16, %s958_s8, [#allocation6]  }
  0x42   : > { %p1113_p0 = scmp.ne.s32.totalorder %s1110_s29, 0 }
  0x43   : > { %p1114_p1 = scmp.ne.s32.totalorder (!%p1113_p0), %s1111_s30, 0 }
  0x44   : > { %242 = sbr.rel (%p1113_p0) target bundleno = 345 (0x159), region = 36 }
  0x4b   : > { %822 = dma.done.wait (%p1114_p1), [#allocation3], 16  }
  0x4c   : > { %824 = vsyncadd (%p1114_p1), [#allocation3], 4294967280 }
  0x4d   : > { %826 = dma.done.wait (%p1114_p1), [#allocation6], 16  }
  0x4e   : > { %828 = vsyncadd (%p1114_p1), [#allocation6], 4294967280  ;;  %v859_v0 = vmov 0.0   ;;  %vm860_vm0 = vmmov 0   ;;  %v705_v1 = vld [vmem:[%s1100_s1] sm:$0xff]   ;;  %v706_v2 = vld [vmem:[%s1100_s1 + $0x8] sm:$0xff]  }
  0x4f   : > { %607 = vmatprep.subr.bf16.mxu0 %v859_v0  ;;  %623 = vmatprep.mubr.msk.bf16.mxu0 %vm860_vm0, %v859_v0  ;;  %v707_v3 = vld [vmem:[%s1100_s1 + $0x10] sm:$0xff]   ;;  %v708_v4 = vld [vmem:[%s1100_s1 + $0x18] sm:$0xff]   ;;  %v709_v5 = vld [vmem:[%s1100_s1 + $0x20] sm:$0xff]   ;;  %p282_p13 = scmp.lt.s32.totalorder %s847_s18, 1  ;;  %s279_s30 = sand.u32 1, %s839_s16  }
  0x50   : > { %608 = vmatpush3.bf16.msra.mxu0 %v705_v1  ;;  %v710_v6 = vld [vmem:[%s1100_s1 + $0x28] sm:$0xff]   ;;  %v711_v7 = vld [vmem:[%s1100_s1 + $0x30] sm:$0xff]   ;;  %v712_v8 = vld [vmem:[%s1100_s1 + $0x38] sm:$0xff]   ;;  %s582_s11 = sshll.u32 %s279_s30, 3  ;;  %s595_s12 = sshll.u32 %s847_s18, 7 }
  0x51   : > { %609 = vmatprep.subr.bf16.mxu0 %v859_v0  ;;  %s283_s6 = scalar_select %p282_p13, %s847_s18, 1  ;;  %v592_v10 = vld [vmem:[#allocation2] ss:$0 sm:$0xff]  ;;  %v593_v12 = vld [vmem:[#allocation5] ss:$0 sm:$0xff] }
  0x52   : > { %s281_s13 = scalar_lea.vmem [#allocation7], %s582_s11  ;;  %s440_s24 = scalar_lea.sflag [#allocation4], %s279_s30 }
  0x53   : > { %s583_s5 = sshll.u32 %s283_s6, 2  ;;  %s454_s14 = sshll.u32 %s281_s13, 4  ;;  %s1054_s14 = int_to_ptr.vmem [resolvable:$true] %s454_s14 }
  0x54   : > { %610 = vmatpush3.bf16.msra.mxu0 %v706_v2  ;;  %s288_s10 = scalar_lea.vmem %s1099_s0, %s583_s5  ;;  %s1052_s6 = scalar_lea.hbm %s1103_s4, %s595_s12 }
  0x55   : > { %611 = vmatprep.subr.bf16.mxu0 %v859_v0  ;;  %v299_v9 = vld [vmem:[%s288_s10] sm:$0xf]  ;;  %s769_s26 = scalar_lea.vmem %s1054_s14, 128  ;;  %p1115_p8 = scmp.ne.s32.totalorder %s1108_s25, 0 }
  0x56   : > { %p770_p4 = scmp.ne.s32.totalorder %s1054_s14, %s769_s26  ;;  %s861_s18 = smov [#allocation7]  }
  0x57   : > { %s773_s5 = sshll.u32 %s861_s18, 4  ;;  %s774_s5 = int_to_ptr.vmem [resolvable:$false] %s773_s5 }
  0x58   : > { %612 = vmatpush3.bf16.msra.mxu0 %v707_v3  ;;  %p771_p10 = pnand %p770_p4, %p1115_p8  ;;  %s775_s8 = scalar_lea.vmem %s774_s5, 256 }
  0x59   : > { %613 = vmatprep.subr.bf16.mxu0 %v859_v0  ;;  %p776_p2 = scmp.lt.s32.totalorder %s1054_s14, %s774_s5  ;;  %p777_p3 = scmp.lt.s32.totalorder %s775_s8, %s769_s26 }
  0x5a   : > { %p772_p11 = pneg %p771_p10 }
  0x5b   : > { %p778_p5 = por %p777_p3, %p776_p2 }
  0x5c   : > { %614 = vmatpush3.bf16.msra.mxu0 %v708_v4 }
  0x5d   : > { %615 = vmatprep.subr.bf16.mxu0 %v859_v0  ;;  %p779_p6 = pnand %p778_p5, %p772_p11 }
  0x60   : > { %616 = vmatpush3.bf16.msra.mxu0 %v709_v5 }
  0x61   : > { %617 = vmatprep.subr.bf16.mxu0 %v859_v0 }
  0x64   : > { %618 = vmatpush3.bf16.msra.mxu0 %v710_v6 }
  0x65   : > { %619 = vmatprep.subr.bf16.mxu0 %v859_v0 }
  0x68   : > { %620 = vmatpush3.bf16.msra.mxu0 %v711_v7 }
  0x69   : > { %621 = vmatprep.subr.bf16.mxu0 %v859_v0 }
  0x6c   : > { %622 = vmatpush3.bf16.msra.mxu0 %v712_v8 }
  0x6f   : > { %624 = vmatmul.mubr.bf16.vlgmr.msra.gmra.mrb[0].mxu0 %v299_v9 }
 0x142   : > { %v398_v11 = vpop.f32.mrb[0].mxu0 }
 0x143   : > { %v427_v13 = vmul.f32 %v592_v10, %v398_v11  ;;  %v625_v14 = vpop.f32.mrb[1].mxu0 }
 0x144   : > { %v401_v15 = vpop.f32.mrb[2].mxu0 }
 0x145   : > { %v435_v16 = vadd.f32 %v593_v12, %v427_v13  ;;  %v626_v17 = vpop.f32.mrb[3].mxu0 }
 0x147   : > { %v436_v18 = vmul.f32 0.2, %v435_v16 }
 0x149   : > { %v437_v19 = vmax.f32 %v435_v16, %v436_v18 }
 0x14b   : > { %438 = vst [vmem:[%s281_s13] sm:$0xff] %v437_v19 }
 0x14c   : > { %782 = shalt.err (!%p779_p6)
}
 0x14d   : > { %s783_s29 = scalar_lea.hbm %s1052_s6, 128  ;;  %s787_s10 = scalar_lea.hbm %s1103_s4, 256 }
 0x14e   : > { %p784_p7 = scmp.ne.s32.totalorder %s1052_s6, %s783_s29  ;;  %p788_p0 = scmp.lt.u32.totalorder %s1052_s6, %s1103_s4 }
 0x14f   : > { %p789_p1 = scmp.lt.u32.totalorder %s787_s10, %s783_s29  ;;  %p791_p4 = scmp.lt.u32.totalorder %s783_s29, %s1052_s6 }
 0x150   : > { %p785_p9 = pnand %p784_p7, %p1115_p8 }
 0x151   : > { %p790_p13 = por %p789_p1, %p788_p0 }
 0x152   : > { %p786_p12 = pneg %p785_p9 }
 0x153   : > { %p792_p10 = por %p791_p4, %p790_p13 }
 0x155   : > { %p793_p11 = pnand %p792_p10, %p786_p12 }
 0x157   : > { %796 = shalt.err (!%p793_p11)
}
 0x158   : > { %635 = dma.vmem_to_hbm [thread:$0]  (%p1115_p8), %s1054_s14, 128, %s1052_s6, %s440_s24  }
 0x159 PF: > { %p652_p2 = scmp.ge.s32.totalorder %s855_s20, 2  ;;  %s466_s12 = sand.u32 1, %s835_s15  }
 0x15a   : > { %p1116_p3 = scmp.ne.s32.totalorder %s1109_s27, 0  ;;  %s467_s13 = scalar_lea.sflag [#allocation4], %s466_s12 }
 0x15c   : > { %p645_p5 = pnand %p652_p2, %p1116_p3 }
 0x15e   : > { %830 = dma.done.wait (!%p645_p5), %s467_s13, 128  }
 0x15f   : > { %832 = vsyncadd (!%p645_p5), %s467_s13, 4294967168  ;;  %s19_s20 = sadd.s32 1, %s855_s20   ;;  %s1117_s15 = smov %s839_s16 }
 0x160   : > { %p16_p6 = scmp.ge.s32.totalorder %s19_s20, 4   ;;  %s1118_s16 = smov %s843_s17 }
 0x161   : > { %s1119_s17 = smov %s940_s28  ;;  %s1120_s18 = smov %s851_s19 }
 0x162   : > { %s1121_s19 = smov %s1123_s23  ;;  %18 = sbr.rel (!%p16_p6) target bundleno = 6 (0x6), region = 97 }
 0x169   :  { %472 = vsyncpa [#allocation3], 1 }
 0x16a   :  { %474 = vsyncpa [#allocation3 + $0x1], 1 }
 0x16b   :  { %475 = vsyncpa [#allocation6], 1 }
 0x16c   :  { %476 = vsyncpa [#allocation4], 1 }
 0x16d   :  { %478 = vsyncpa [#allocation4 + $0x1], 1 }

</bundles_post_ra>
